<compile_context>
chip_gen: v7x
topology: tpu7x:2x2x1
jax: 0.10.0
libtpu: 0.0.40
codegen_flags: <defaults>
</compile_context>

<pallas_src>
import jax
import jax.numpy as jnp
from jax.experimental import pallas as pl
from jax.experimental.pallas import tpu as pltpu


def _make_kernel(shift_groups, n_ci, mp):
    """Builds the conv kernel for a fixed tap/shift structure.

    Refs:
      pg_ref : (1, 4, ci_blk, mp)  phase planes (compute dtype), lane-dense Mp
      w_ref  : (9, co_blk, ci_blk) per-tap weights
      b_ref  : (co_blk, 1)         bias column (f32)
      o_ref  : (1, co_blk, mp)     output tile (f32)
      acc_ref: (co_blk, mp)        f32 accumulator, resident across Cin axis
    """

    def kernel(pg_ref, w_ref, b_ref, o_ref, acc_ref):
        ci = pl.program_id(2)

        @pl.when(ci == 0)
        def _init():
            acc_ref[...] = jnp.zeros_like(acc_ref)

        # 3x3 taps as 9 MXU matmuls against the resident phase planes; the
        # (kh//2, kw//2) spatial shifts are static lane offsets, grouped so
        # each distinct shift touches the accumulator once.
        for s, taps in shift_groups:
            part = None
            for t, p in taps:
                if s:
                    op = pg_ref[0, p, :, s:]
                else:
                    op = pg_ref[0, p]
                prod = jnp.dot(w_ref[t], op, preferred_element_type=jnp.float32)
                part = prod if part is None else part + prod
            if s:
                acc_ref[:, : mp - s] += part
            else:
                acc_ref[...] += part

        @pl.when(ci == n_ci - 1)
        def _finalize():
            o_ref[0] = (acc_ref[...] + b_ref[...]).astype(o_ref.dtype)

    return kernel


def downsample_layer(x_nchw, weight, bias, *, compute_dtype=jnp.bfloat16):
    """Equivalent of nn.Conv2d(in_ch, out_ch, kernel_size=3, stride=2, padding=1).

    x_nchw : (N, Cin, H, W)    float32
    weight : (Cout, Cin, 3, 3) float32 (PyTorch OIHW layout)
    bias   : (Cout,)           float32
    returns: (N, Cout, OH, OW) float32, OH = (H+1)//2, OW = (W+1)//2
    """
    n, cin, h, w = x_nchw.shape
    cout = weight.shape[0]
    oh = (h + 1) // 2
    ow = (w + 1) // 2
    ohp, owp = oh + 1, ow + 1          # +1 halo row/col so shifted taps stay in-range
    mp = ohp * owp
    cdt = jnp.dtype(compute_dtype)
    cb = cdt.itemsize

    # ---- glue: single phase-split copy of the padded input (no im2col) ------
    xq = jnp.pad(
        x_nchw.astype(cdt),
        ((0, 0), (0, 0), (1, 2 * ohp - 1 - h), (1, 2 * owp - 1 - w)),
    )
    # (N, Cin, 2*OHp, 2*OWp) -> (N, ph, pw, Cin, OHp, OWp) -> (N, 4, Cin, Mp)
    phases = (
        xq.reshape(n, cin, ohp, 2, owp, 2)
        .transpose(0, 3, 5, 1, 2, 4)
        .reshape(n, 4, cin, mp)
    )

    # weight (Cout, Cin, 3, 3) -> (9, Cout, Cin) with t = kh*3 + kw.
    w9 = jnp.transpose(weight, (2, 3, 0, 1)).reshape(9, cout, cin).astype(cdt)
    b_col = bias.reshape(cout, 1).astype(jnp.float32)

    # Tap bookkeeping: phase plane index + static flat shift, grouped by shift.
    groups = {}
    for kh in range(3):
        for kw in range(3):
            s = (kh // 2) * owp + (kw // 2)
            p = (kh % 2) * 2 + (kw % 2)
            groups.setdefault(s, []).append((kh * 3 + kw, p))
    shift_groups = tuple(sorted((s, tuple(t)) for s, t in groups.items()))

    # ---- tile selection (generation-aware VMEM budget) -----------------------
    try:
        vmem_phys = int(pltpu.get_tpu_info().vmem_capacity_bytes)
    except Exception:  # conservative (v7x-sized) default if the query fails
        vmem_phys = 64 * 1024 * 1024
    budget = vmem_phys // 2

    def _need(co_blk, ci_blk):
        return (
            2 * 4 * ci_blk * mp * cb        # phase planes (double-buffered)
            + 2 * 9 * co_blk * ci_blk * cb  # weights
            + 2 * co_blk * 4                # bias
            + 2 * co_blk * mp * 4           # output tile
            + co_blk * mp * 4               # f32 accumulator
            + 4 * co_blk * mp * 4           # matmul / group temporaries headroom
        )

    # Cin tiling only when it keeps the weight BlockSpec last dim lane-aligned.
    ci_cands = [cin] + [c for c in (512, 256, 128) if cin % c == 0 and c < cin]
    # Prefer the full Cout so the phase planes stream through HBM exactly once.
    co_cands = [cout] + [
        c for c in (512, 256, 128, 64, 32, 16, 8) if cout % c == 0 and c < cout
    ]

    co_blk, ci_blk = co_cands[-1], ci_cands[-1]
    found = False
    for co in co_cands:
        for ci in ci_cands:
            if _need(co, ci) <= budget:
                co_blk, ci_blk = co, ci
                found = True
                break
        if found:
            break
    # TODO(synk): spatial (Mp) tiling with a one-row halo when even the
    # smallest (co_blk, ci_blk) working set exceeds the VMEM budget.

    n_co = cout // co_blk
    n_ci = cin // ci_blk
    grid = (n, n_co, n_ci)

    vmem_limit = int(
        min(vmem_phys * 4 // 5, max(32 * 1024 * 1024, 2 * _need(co_blk, ci_blk)))
    )

    kernel = _make_kernel(shift_groups, n_ci, mp)

    out_flat = pl.pallas_call(
        kernel,
        out_shape=jax.ShapeDtypeStruct((n, cout, mp), jnp.float32),
        grid_spec=pltpu.PrefetchScalarGridSpec(
            num_scalar_prefetch=0,
            grid=grid,
            in_specs=[
                pl.BlockSpec((1, 4, ci_blk, mp), lambda b, co, ci: (b, 0, ci, 0)),
                pl.BlockSpec((9, co_blk, ci_blk), lambda b, co, ci: (0, co, ci)),
                pl.BlockSpec((co_blk, 1), lambda b, co, ci: (co, 0)),
            ],
            out_specs=pl.BlockSpec((1, co_blk, mp), lambda b, co, ci: (b, co, 0)),
            scratch_shapes=[pltpu.VMEM((co_blk, mp), jnp.float32)],
        ),
        compiler_params=pltpu.CompilerParams(
            dimension_semantics=("parallel", "parallel", "arbitrary"),
            vmem_limit_bytes=vmem_limit,
        ),
    )(phases, w9, b_col)

    # (N, Cout, Mp) -> (N, Cout, OHp, OWp) -> crop the +1 halo row/col.
    return out_flat.reshape(n, cout, ohp, owp)[:, :, :oh, :ow]


if __name__ == "__main__":
    key = jax.random.PRNGKey(0)
    k_x, k_w, k_b = jax.random.split(key, 3)

    N, IN_CH, OUT_CH, H, W = 2, 4, 8, 16, 16

    x = jax.random.normal(k_x, (N, IN_CH, H, W), dtype=jnp.float32)
    weight = jax.random.normal(k_w, (OUT_CH, IN_CH, 3, 3), dtype=jnp.float32) * 0.1
    bias = jax.random.normal(k_b, (OUT_CH,), dtype=jnp.float32) * 0.1

    # Reference: XLA conv matching PyTorch Conv2d(3, stride=2, padding=1).
    ref = jax.lax.conv_general_dilated(
        x, weight, window_strides=(2, 2), padding=((1, 1), (1, 1)),
        dimension_numbers=("NCHW", "OIHW", "NCHW"),
        precision=jax.lax.Precision.HIGHEST,
    ) + bias.reshape(1, OUT_CH, 1, 1)

    fwd = jax.jit(downsample_layer, static_argnames=("compute_dtype",))

    # exact-ish path: f32 MXU inputs
    out_f32 = jax.block_until_ready(fwd(x, weight, bias, compute_dtype=jnp.float32))
    assert out_f32.shape == (N, OUT_CH, (H + 1) // 2, (W + 1) // 2), out_f32.shape
    assert jnp.allclose(out_f32, ref, rtol=1e-3, atol=1e-3), "f32 mismatch vs reference"

    # default fast path: bf16 MXU inputs, f32 accumulation
    out_bf16 = jax.block_until_ready(fwd(x, weight, bias))
    assert out_bf16.shape == (N, OUT_CH, (H + 1) // 2, (W + 1) // 2), out_bf16.shape
    assert jnp.allclose(out_bf16, ref, rtol=5e-2, atol=5e-2), "bf16 mismatch vs reference"

    print("KERNEL_OK")
</pallas_src>

<mosaic_0001>
module attributes {stable_mosaic.version = 11 : i64} {
  func.func @kernel(%arg0: i32, %arg1: i32, %arg2: i32, %arg3: memref<1x4x4x81xf32, #tpu.memory_space<vmem>>, %arg4: memref<9x8x4xf32, #tpu.memory_space<vmem>>, %arg5: memref<8x1xf32, #tpu.memory_space<vmem>>, %arg6: memref<1x8x81xf32, #tpu.memory_space<vmem>>, %arg7: memref<8x81xf32, #tpu.memory_space<vmem>>) attributes {dimension_semantics = [#tpu.dimension_semantics<parallel>, #tpu.dimension_semantics<parallel>, #tpu.dimension_semantics<arbitrary>], iteration_bounds = array<i64: 2, 1, 1>, scalar_prefetch = 0 : i64, scratch_operands = 1 : i64, tpu.core_type = #tpu.core_type<tc>, window_params = [{transform_indices = @transform_0, window_bounds = array<i64: 1, 4, 4, 81>}, {transform_indices = @transform_1, window_bounds = array<i64: 9, 8, 4>}, {transform_indices = @transform_2, window_bounds = array<i64: 8, 1>}, {transform_indices = @transform_3, window_bounds = array<i64: 1, 8, 81>}]} {
    %c0_i32 = arith.constant 0 : i32
    %0 = arith.cmpi eq, %arg2, %c0_i32 : i32
    %1 = arith.extui %0 : i1 to i32
    %c0_i32_0 = arith.constant 0 : i32
    %2 = arith.cmpi ne, %1, %c0_i32_0 : i32
    scf.if %2 {
      %cst_79 = arith.constant 0.000000e+00 : f32
      %68 = vector.broadcast %cst_79 : f32 to vector<8x81xf32>
      %c0_80 = arith.constant 0 : index
      %c0_81 = arith.constant 0 : index
      %69 = vector.load %arg7[%c0_80, %c0_81] : memref<8x81xf32, #tpu.memory_space<vmem>>, vector<8x81xf32>
      tpu.vector_store %arg7[%c0_80, %c0_81], %68 {strides = array<i32>} : memref<8x81xf32, #tpu.memory_space<vmem>>, vector<8x81xf32>,
    } else {
    }
    %c0 = arith.constant 0 : index
    %c0_1 = arith.constant 0 : index
    %c0_2 = arith.constant 0 : index
    %c0_3 = arith.constant 0 : index
    %3 = vector.load %arg3[%c0, %c0_1, %c0_2, %c0_3] : memref<1x4x4x81xf32, #tpu.memory_space<vmem>>, vector<1x1x4x81xf32>
    %4 = vector.shape_cast %3 : vector<1x1x4x81xf32> to vector<4x81xf32>
    %c0_4 = arith.constant 0 : index
    %c0_5 = arith.constant 0 : index
    %c0_6 = arith.constant 0 : index
    %5 = vector.load %arg4[%c0_4, %c0_5, %c0_6] : memref<9x8x4xf32, #tpu.memory_space<vmem>>, vector<1x8x4xf32>
    %6 = vector.shape_cast %5 : vector<1x8x4xf32> to vector<8x4xf32>
    %cst = arith.constant dense<0.000000e+00> : vector<8x81xf32>
    %7 = tpu.matmul %6, %4, %cst {dimension_numbers = #tpu.dot_dimension_numbers<[1], [0], [0], [1], [0, 0, 1, 1], [], []>} : vector<8x4xf32>, vector<4x81xf32>, vector<8x81xf32> -> vector<8x81xf32>
    %c0_7 = arith.constant 0 : index
    %c1 = arith.constant 1 : index
    %c0_8 = arith.constant 0 : index
    %c0_9 = arith.constant 0 : index
    %8 = vector.load %arg3[%c0_7, %c1, %c0_8, %c0_9] : memref<1x4x4x81xf32, #tpu.memory_space<vmem>>, vector<1x1x4x81xf32>
    %9 = vector.shape_cast %8 : vector<1x1x4x81xf32> to vector<4x81xf32>
    %c1_10 = arith.constant 1 : index
    %c0_11 = arith.constant 0 : index
    %c0_12 = arith.constant 0 : index
    %10 = vector.load %arg4[%c1_10, %c0_11, %c0_12] : memref<9x8x4xf32, #tpu.memory_space<vmem>>, vector<1x8x4xf32>
    %11 = vector.shape_cast %10 : vector<1x8x4xf32> to vector<8x4xf32>
    %cst_13 = arith.constant dense<0.000000e+00> : vector<8x81xf32>
    %12 = tpu.matmul %11, %9, %cst_13 {dimension_numbers = #tpu.dot_dimension_numbers<[1], [0], [0], [1], [0, 0, 1, 1], [], []>} : vector<8x4xf32>, vector<4x81xf32>, vector<8x81xf32> -> vector<8x81xf32>
    %13 = arith.addf %7, %12 : vector<8x81xf32>
    %c0_14 = arith.constant 0 : index
    %c2 = arith.constant 2 : index
    %c0_15 = arith.constant 0 : index
    %c0_16 = arith.constant 0 : index
    %14 = vector.load %arg3[%c0_14, %c2, %c0_15, %c0_16] : memref<1x4x4x81xf32, #tpu.memory_space<vmem>>, vector<1x1x4x81xf32>
    %15 = vector.shape_cast %14 : vector<1x1x4x81xf32> to vector<4x81xf32>
    %c3 = arith.constant 3 : index
    %c0_17 = arith.constant 0 : index
    %c0_18 = arith.constant 0 : index
    %16 = vector.load %arg4[%c3, %c0_17, %c0_18] : memref<9x8x4xf32, #tpu.memory_space<vmem>>, vector<1x8x4xf32>
    %17 = vector.shape_cast %16 : vector<1x8x4xf32> to vector<8x4xf32>
    %cst_19 = arith.constant dense<0.000000e+00> : vector<8x81xf32>
    %18 = tpu.matmul %17, %15, %cst_19 {dimension_numbers = #tpu.dot_dimension_numbers<[1], [0], [0], [1], [0, 0, 1, 1], [], []>} : vector<8x4xf32>, vector<4x81xf32>, vector<8x81xf32> -> vector<8x81xf32>
    %19 = arith.addf %13, %18 : vector<8x81xf32>
    %c0_20 = arith.constant 0 : index
    %c3_21 = arith.constant 3 : index
    %c0_22 = arith.constant 0 : index
    %c0_23 = arith.constant 0 : index
    %20 = vector.load %arg3[%c0_20, %c3_21, %c0_22, %c0_23] : memref<1x4x4x81xf32, #tpu.memory_space<vmem>>, vector<1x1x4x81xf32>
    %21 = vector.shape_cast %20 : vector<1x1x4x81xf32> to vector<4x81xf32>
    %c4 = arith.constant 4 : index
    %c0_24 = arith.constant 0 : index
    %c0_25 = arith.constant 0 : index
    %22 = vector.load %arg4[%c4, %c0_24, %c0_25] : memref<9x8x4xf32, #tpu.memory_space<vmem>>, vector<1x8x4xf32>
    %23 = vector.shape_cast %22 : vector<1x8x4xf32> to vector<8x4xf32>
    %cst_26 = arith.constant dense<0.000000e+00> : vector<8x81xf32>
    %24 = tpu.matmul %23, %21, %cst_26 {dimension_numbers = #tpu.dot_dimension_numbers<[1], [0], [0], [1], [0, 0, 1, 1], [], []>} : vector<8x4xf32>, vector<4x81xf32>, vector<8x81xf32> -> vector<8x81xf32>
    %25 = arith.addf %19, %24 : vector<8x81xf32>
    %c0_27 = arith.constant 0 : index
    %c0_28 = arith.constant 0 : index
    %26 = vector.load %arg7[%c0_27, %c0_28] : memref<8x81xf32, #tpu.memory_space<vmem>>, vector<8x81xf32>
    %27 = arith.addf %26, %25 : vector<8x81xf32>
    %c0_29 = arith.constant 0 : index
    %c0_30 = arith.constant 0 : index
    %28 = vector.load %arg7[%c0_29, %c0_30] : memref<8x81xf32, #tpu.memory_space<vmem>>, vector<8x81xf32>
    tpu.vector_store %arg7[%c0_29, %c0_30], %27 {strides = array<i32>} : memref<8x81xf32, #tpu.memory_space<vmem>>, vector<8x81xf32>,
    %c0_31 = arith.constant 0 : index
    %c0_32 = arith.constant 0 : index
    %c0_33 = arith.constant 0 : index
    %c1_34 = arith.constant 1 : index
    %29 = vector.load %arg3[%c0_31, %c0_32, %c0_33, %c1_34] : memref<1x4x4x81xf32, #tpu.memory_space<vmem>>, vector<1x1x4x80xf32>
    %30 = vector.shape_cast %29 : vector<1x1x4x80xf32> to vector<4x80xf32>
    %c2_35 = arith.constant 2 : index
    %c0_36 = arith.constant 0 : index
    %c0_37 = arith.constant 0 : index
    %31 = vector.load %arg4[%c2_35, %c0_36, %c0_37] : memref<9x8x4xf32, #tpu.memory_space<vmem>>, vector<1x8x4xf32>
    %32 = vector.shape_cast %31 : vector<1x8x4xf32> to vector<8x4xf32>
    %cst_38 = arith.constant dense<0.000000e+00> : vector<8x80xf32>
    %33 = tpu.matmul %32, %30, %cst_38 {dimension_numbers = #tpu.dot_dimension_numbers<[1], [0], [0], [1], [0, 0, 1, 1], [], []>} : vector<8x4xf32>, vector<4x80xf32>, vector<8x80xf32> -> vector<8x80xf32>
    %c0_39 = arith.constant 0 : index
    %c2_40 = arith.constant 2 : index
    %c0_41 = arith.constant 0 : index
    %c1_42 = arith.constant 1 : index
    %34 = vector.load %arg3[%c0_39, %c2_40, %c0_41, %c1_42] : memref<1x4x4x81xf32, #tpu.memory_space<vmem>>, vector<1x1x4x80xf32>
    %35 = vector.shape_cast %34 : vector<1x1x4x80xf32> to vector<4x80xf32>
    %c5 = arith.constant 5 : index
    %c0_43 = arith.constant 0 : index
    %c0_44 = arith.constant 0 : index
    %36 = vector.load %arg4[%c5, %c0_43, %c0_44] : memref<9x8x4xf32, #tpu.memory_space<vmem>>, vector<1x8x4xf32>
    %37 = vector.shape_cast %36 : vector<1x8x4xf32> to vector<8x4xf32>
    %cst_45 = arith.constant dense<0.000000e+00> : vector<8x80xf32>
    %38 = tpu.matmul %37, %35, %cst_45 {dimension_numbers = #tpu.dot_dimension_numbers<[1], [0], [0], [1], [0, 0, 1, 1], [], []>} : vector<8x4xf32>, vector<4x80xf32>, vector<8x80xf32> -> vector<8x80xf32>
    %39 = arith.addf %33, %38 : vector<8x80xf32>
    %c0_46 = arith.constant 0 : index
    %c0_47 = arith.constant 0 : index
    %40 = vector.load %arg7[%c0_46, %c0_47] : memref<8x81xf32, #tpu.memory_space<vmem>>, vector<8x80xf32>
    %41 = arith.addf %40, %39 : vector<8x80xf32>
    %c0_48 = arith.constant 0 : index
    %c0_49 = arith.constant 0 : index
    %42 = vector.load %arg7[%c0_48, %c0_49] : memref<8x81xf32, #tpu.memory_space<vmem>>, vector<8x80xf32>
    tpu.vector_store %arg7[%c0_48, %c0_49], %41 {strides = array<i32>} : memref<8x81xf32, #tpu.memory_space<vmem>>, vector<8x80xf32>,
    %c0_50 = arith.constant 0 : index
    %c0_51 = arith.constant 0 : index
    %c0_52 = arith.constant 0 : index
    %c9 = arith.constant 9 : index
    %43 = vector.load %arg3[%c0_50, %c0_51, %c0_52, %c9] : memref<1x4x4x81xf32, #tpu.memory_space<vmem>>, vector<1x1x4x72xf32>
    %44 = vector.shape_cast %43 : vector<1x1x4x72xf32> to vector<4x72xf32>
    %c6 = arith.constant 6 : index
    %c0_53 = arith.constant 0 : index
    %c0_54 = arith.constant 0 : index
    %45 = vector.load %arg4[%c6, %c0_53, %c0_54] : memref<9x8x4xf32, #tpu.memory_space<vmem>>, vector<1x8x4xf32>
    %46 = vector.shape_cast %45 : vector<1x8x4xf32> to vector<8x4xf32>
    %cst_55 = arith.constant dense<0.000000e+00> : vector<8x72xf32>
    %47 = tpu.matmul %46, %44, %cst_55 {dimension_numbers = #tpu.dot_dimension_numbers<[1], [0], [0], [1], [0, 0, 1, 1], [], []>} : vector<8x4xf32>, vector<4x72xf32>, vector<8x72xf32> -> vector<8x72xf32>
    %c0_56 = arith.constant 0 : index
    %c1_57 = arith.constant 1 : index
    %c0_58 = arith.constant 0 : index
    %c9_59 = arith.constant 9 : index
    %48 = vector.load %arg3[%c0_56, %c1_57, %c0_58, %c9_59] : memref<1x4x4x81xf32, #tpu.memory_space<vmem>>, vector<1x1x4x72xf32>
    %49 = vector.shape_cast %48 : vector<1x1x4x72xf32> to vector<4x72xf32>
    %c7 = arith.constant 7 : index
    %c0_60 = arith.constant 0 : index
    %c0_61 = arith.constant 0 : index
    %50 = vector.load %arg4[%c7, %c0_60, %c0_61] : memref<9x8x4xf32, #tpu.memory_space<vmem>>, vector<1x8x4xf32>
    %51 = vector.shape_cast %50 : vector<1x8x4xf32> to vector<8x4xf32>
    %cst_62 = arith.constant dense<0.000000e+00> : vector<8x72xf32>
    %52 = tpu.matmul %51, %49, %cst_62 {dimension_numbers = #tpu.dot_dimension_numbers<[1], [0], [0], [1], [0, 0, 1, 1], [], []>} : vector<8x4xf32>, vector<4x72xf32>, vector<8x72xf32> -> vector<8x72xf32>
    %53 = arith.addf %47, %52 : vector<8x72xf32>
    %c0_63 = arith.constant 0 : index
    %c0_64 = arith.constant 0 : index
    %54 = vector.load %arg7[%c0_63, %c0_64] : memref<8x81xf32, #tpu.memory_space<vmem>>, vector<8x72xf32>
    %55 = arith.addf %54, %53 : vector<8x72xf32>
    %c0_65 = arith.constant 0 : index
    %c0_66 = arith.constant 0 : index
    %56 = vector.load %arg7[%c0_65, %c0_66] : memref<8x81xf32, #tpu.memory_space<vmem>>, vector<8x72xf32>
    tpu.vector_store %arg7[%c0_65, %c0_66], %55 {strides = array<i32>} : memref<8x81xf32, #tpu.memory_space<vmem>>, vector<8x72xf32>,
    %c0_67 = arith.constant 0 : index
    %c0_68 = arith.constant 0 : index
    %c0_69 = arith.constant 0 : index
    %c10 = arith.constant 10 : index
    %57 = vector.load %arg3[%c0_67, %c0_68, %c0_69, %c10] : memref<1x4x4x81xf32, #tpu.memory_space<vmem>>, vector<1x1x4x71xf32>
    %58 = vector.shape_cast %57 : vector<1x1x4x71xf32> to vector<4x71xf32>
    %c8 = arith.constant 8 : index
    %c0_70 = arith.constant 0 : index
    %c0_71 = arith.constant 0 : index
    %59 = vector.load %arg4[%c8, %c0_70, %c0_71] : memref<9x8x4xf32, #tpu.memory_space<vmem>>, vector<1x8x4xf32>
    %60 = vector.shape_cast %59 : vector<1x8x4xf32> to vector<8x4xf32>
    %cst_72 = arith.constant dense<0.000000e+00> : vector<8x71xf32>
    %61 = tpu.matmul %60, %58, %cst_72 {dimension_numbers = #tpu.dot_dimension_numbers<[1], [0], [0], [1], [0, 0, 1, 1], [], []>} : vector<8x4xf32>, vector<4x71xf32>, vector<8x71xf32> -> vector<8x71xf32>
    %c0_73 = arith.constant 0 : index
    %c0_74 = arith.constant 0 : index
    %62 = vector.load %arg7[%c0_73, %c0_74] : memref<8x81xf32, #tpu.memory_space<vmem>>, vector<8x71xf32>
    %63 = arith.addf %62, %61 : vector<8x71xf32>
    %c0_75 = arith.constant 0 : index
    %c0_76 = arith.constant 0 : index
    %64 = vector.load %arg7[%c0_75, %c0_76] : memref<8x81xf32, #tpu.memory_space<vmem>>, vector<8x71xf32>
    tpu.vector_store %arg7[%c0_75, %c0_76], %63 {strides = array<i32>} : memref<8x81xf32, #tpu.memory_space<vmem>>, vector<8x71xf32>,
    %c0_i32_77 = arith.constant 0 : i32
    %65 = arith.cmpi eq, %arg2, %c0_i32_77 : i32
    %66 = arith.extui %65 : i1 to i32
    %c0_i32_78 = arith.constant 0 : i32
    %67 = arith.cmpi ne, %66, %c0_i32_78 : i32
    scf.if %67 {
      %c0_79 = arith.constant 0 : index
      %c0_80 = arith.constant 0 : index
      %68 = vector.load %arg7[%c0_79, %c0_80] : memref<8x81xf32, #tpu.memory_space<vmem>>, vector<8x81xf32>
      %c0_81 = arith.constant 0 : index
      %c0_82 = arith.constant 0 : index
      %69 = vector.load %arg5[%c0_81, %c0_82] : memref<8x1xf32, #tpu.memory_space<vmem>>, vector<8x1xf32>
      %70 = vector.broadcast %69 : vector<8x1xf32> to vector<8x81xf32>
      %71 = arith.addf %68, %70 : vector<8x81xf32>
      %c0_83 = arith.constant 0 : index
      %c0_84 = arith.constant 0 : index
      %c0_85 = arith.constant 0 : index
      %72 = vector.load %arg6[%c0_83, %c0_84, %c0_85] : memref<1x8x81xf32, #tpu.memory_space<vmem>>, vector<1x8x81xf32>
      %73 = vector.shape_cast %72 : vector<1x8x81xf32> to vector<8x81xf32>
      %74 = vector.shape_cast %71 : vector<8x81xf32> to vector<1x8x81xf32>
      tpu.vector_store %arg6[%c0_83, %c0_84, %c0_85], %74 {strides = array<i32>} : memref<1x8x81xf32, #tpu.memory_space<vmem>>, vector<1x8x81xf32>,
    } else {
    }
    return
  }
  func.func @transform_0(%arg0: i32, %arg1: i32, %arg2: i32) -> (i32, i32, i32, i32) {
    %c0_i32 = arith.constant 0 : i32
    %c0_i32_0 = arith.constant 0 : i32
    %c0_i32_1 = arith.constant 0 : i32
    return %arg0, %c0_i32, %arg2, %c0_i32_0 : i32, i32, i32, i32
  }
  func.func @transform_1(%arg0: i32, %arg1: i32, %arg2: i32) -> (i32, i32, i32) {
    %c0_i32 = arith.constant 0 : i32
    %c0_i32_0 = arith.constant 0 : i32
    return %c0_i32, %arg1, %arg2 : i32, i32, i32
  }
  func.func @transform_2(%arg0: i32, %arg1: i32, %arg2: i32) -> (i32, i32) {
    %c0_i32 = arith.constant 0 : i32
    %c0_i32_0 = arith.constant 0 : i32
    return %arg1, %c0_i32 : i32, i32
  }
  func.func @transform_3(%arg0: i32, %arg1: i32, %arg2: i32) -> (i32, i32, i32) {
    %c0_i32 = arith.constant 0 : i32
    %c0_i32_0 = arith.constant 0 : i32
    return %arg0, %arg1, %c0_i32 : i32, i32, i32
  }
}

</mosaic_0001>

<bundles_post_ra>
// kernel: downsample_layer.1
= control target key start
LH: loop header
LB: loop body
LE: loop exit
PB: predicated region body
PF: predicated region fallthrough
CT: control target
= control target key end

     0   :  { %s1316_s12 = smov 0   ;;  %s1318_s13 = smov 0   ;;  %s1432_s0 = inlined_call_operand.vmem [shape: f32[2,4,4,81], index: 0, kind: input, shape index: {}]   ;;  %s1433_s1 = inlined_call_operand.vmem [shape: f32[9,8,4], index: 1, kind: input, shape index: {}]   ;;  %s1434_s2 = inlined_call_operand.vmem [shape: f32[8,1], index: 2, kind: input, shape index: {}]   ;;  %s1435_s3 = inlined_call_operand.vmem [shape: f32[2,8,81], index: 3, kind: output, shape index: {}]  }
   0x1   :  { %s1320_s14 = smov 0  }
   0x2 LB: > { %s32_s15 = sadd.s32 1, %s1284_s13  ;;  %p1133_p0 = scmp.ge.s32.totalorder %s1288_s14, 1  ;;  %s1288_s14 = sphi %s1320_s14, %s13_s14   ;;  %s1284_s13 = sphi %s1318_s13, %s1437_s13   ;;  %s1280_s12 = sphi %s1316_s12, %s1436_s12  }
   0x3   : > { %p34_p1 = scmp.ge.s32.totalorder %s32_s15, 2  ;;  %p186_p2 = scmp.lt.s32.totalorder %s1288_s14, 3 }
   0x5   : > { %s1439_s15 = smov (%p34_p1, %s32_s15), 0  ;;  %p187_p3 = pnand %p1133_p0, %p186_p2 }
   0x6   : > { %p226_p4 = scmp.lt.s32.totalorder (!%p187_p3), %s1280_s12, 1  ;;  %v1290_v0 = vmov (!%p187_p3), 0.0   ;;  %vm1291_vm0 = vmmov (!%p187_p3), 0   ;;  %vm268_vm1 = vcmask (!%p187_p3), 1043456   ;;  %v1292_v3 = vmov (!%p187_p3), 0   ;;  %s1293_s20 = smov (!%p187_p3), 127  }
   0x7   : > { %190 = sbr.rel (%p187_p3) target bundleno = 385 (0x181), region = 32  ;;  %1189 = vmatprep.subr.mxu0 (!%p187_p3), %v1290_v0  ;;  %1191 = vmatprep.mubr.msk.f32.mxu0 (!%p187_p3), %vm1291_vm0, %v1290_v0  ;;  %s1294_s21 = smov (!%p187_p3), 119   ;;  %v1138_v5 = vld [vmem:[%s1433_s1 + $0x8] sm:$0xff] (!%p187_p3)  ;;  %vm264_vm2 = vcmask (!%p187_p3), 31744   ;;  %v259_v9 = vld [vmem:[%s1433_s1] sm:$0xff] (!%p187_p3)  ;;  %v1144_v11 = vld [vmem:[%s1433_s1 + $0x18] sm:$0xff] (!%p187_p3) }
   0x8   : > { %1194 = vmatprep.subr.mxu1 (!%p187_p3), %v1290_v0  ;;  %1196 = vmatprep.mubr.msk.f32.mxu1 (!%p187_p3), %vm1291_vm0, %v1290_v0  ;;  %v1148_v14 = vld [vmem:[%s1433_s1 + $0x20] sm:$0xff] (!%p187_p3)  ;;  %s1295_s30 = smov (!%p187_p3), 118   ;;  %vm256_vm3 = vcmask (!%p187_p3), 662528   ;;  %v1153_v16 = vld [vmem:[%s1433_s1 + $0x28] sm:$0xff] (!%p187_p3)  ;;  %v1151_v19 = vld [vmem:[%s1433_s1 + $0x10] sm:$0xff] (!%p187_p3)  ;;  %vm748_vm4 = vcmask (!%p187_p3), 654336  }
   0x9   : > { %1264 = vset.pattern.permute.xlu1 (!%p187_p3), %v1292_v3  ;;  %1265 = vset.pattern.permute.xlu0 (!%p187_p3), %v1292_v3  ;;  %v1005_v15 = vld [vmem:[%s1434_s2] sm:$0xff] (!%p187_p3)  ;;  %257 = vst.msk [vmem:[#allocation2] sm:$0xff] (!%p187_p3), %vm256_vm3, %v1290_v0  ;;  %v1160_v22 = vld [vmem:[%s1433_s1 + $0x38] sm:$0xff] (!%p187_p3)  ;;  %v1158_v23 = vld [vmem:[%s1433_s1 + $0x30] sm:$0xff] (!%p187_p3)  ;;  %vm914_vm5 = vcmask (!%p187_p3), 588800   ;;  %vm999_vm6 = vcmask (!%p187_p3), 580608  }
   0xa   : > { %v1165_v25 = vld [vmem:[%s1433_s1 + $0x40] sm:$0xff] (!%p187_p3) }
   0xe   : > { %s1441_s12 = smov (!%p226_p4, %s1280_s12), 1 }
   0xf   : > { %s1170_s16 = sshll.u32 %s1441_s12, 4 }
  0x10   : > { %s233_s19 = scalar_lea.vmem %s1432_s0, %s1170_s16  ;;  %v580_v35 = vld [vmem:[#allocation2] sm:$0xff] }
  0x11   : > { %v1152_v1 = vld [vmem:[%s233_s19 + $0x8] sm:$0xf]  ;;  %v1159_v2 = vld [vmem:[%s233_s19 + $0x4] sm:$0xf]  ;;  %v584_v4 = vld [vmem:[%s233_s19] sm:$0xf] }
  0x12   : > { %591 = vrot.lane.b32.xlu0 %v1152_v1, %s1293_s20  ;;  %757 = vrot.lane.b32.xlu1 %v1159_v2, %s1294_s21  ;;  %v750_v6 = vld [vmem:[%s233_s19] sm:$0xf]  ;;  %v1137_v7 = vld [vmem:[%s233_s19 + $0x4] sm:$0xf] }
  0x13   : > { %v258_v8 = vld [vmem:[%s233_s19] sm:$0xf]  ;;  %1190 = vmatpush3.msk.msra.mxu0 %vm268_vm1, %v1137_v7  ;;  %v1143_v10 = vld [vmem:[%s233_s19 + $0x8] sm:$0xf]  ;;  %v1147_v12 = vld [vmem:[%s233_s19 + $0xc] sm:$0xf] }
  0x14   : > { %1195 = vmatpush3.msk.msra.mxu1 %vm268_vm1, %v258_v8  ;;  %1192 = vmatmul.mubr.msk.f32.vlgmr.msra.gmra.mrb[0].mxu0 %vm264_vm2, %v1138_v5  ;;  %v916_v13 = vld [vmem:[%s233_s19] sm:$0xf] }
  0x15   : > { %1199 = vmatprep.subr.mxu0 %v1290_v0  ;;  %1197 = vmatmul.mubr.msk.f32.vlgmr.msra.gmra.mrb[0].mxu1 %vm264_vm2, %v259_v9 }
  0x16   : > { %669 = vrot.lane.b32.xlu0 %v584_v4, %s1293_s20  ;;  %835 = vrot.lane.b32.xlu1 %v750_v6, %s1294_s21  ;;  %s1136_s20 = sshll.u32 %s1441_s12, 3 }
  0x17   : > { %1200 = vmatpush3.msk.msra.mxu0 %vm268_vm1, %v1143_v10  ;;  %1201 = vmatprep.mubr.msk.f32.mxu0 %vm1291_vm0, %v1290_v0  ;;  %s251_s23 = scalar_lea.vmem %s1435_s3, %s1136_s20 }
  0x18   : > { %1204 = vmatprep.subr.mxu1 %v1290_v0  ;;  %1202 = vmatmul.mubr.msk.f32.vlgmr.msra.gmra.mrb[2].mxu0 %vm264_vm2, %v1144_v11 }
  0x19   : > { %1205 = vmatpush3.msk.msra.mxu1 %vm268_vm1, %v1147_v12  ;;  %1206 = vmatprep.mubr.msk.f32.mxu1 %vm1291_vm0, %v1290_v0 }
  0x1a   : > { %920 = vrot.lane.b32.xlu0 %v916_v13, %s1295_s30  ;;  %1207 = vmatmul.mubr.msk.f32.vlgmr.msra.gmra.mrb[2].mxu1 %vm264_vm2, %v1148_v14 }
  0x1b   : > { %1209 = vmatprep.subr.mxu0 %v1290_v0  ;;  %1214 = vmatprep.subr.mxu1 %v1290_v0 }
  0x1c   : > { %1211 = vmatprep.mubr.msk.f32.mxu0 %vm1291_vm0, %v1290_v0  ;;  %1216 = vmatprep.mubr.msk.f32.mxu1 %vm1291_vm0, %v1290_v0 }
  0x1d   : > { %1008 = vperm.xlu1 %1264, %v1005_v15  }
  0x84   : > { %v592_v17 = vpop.permute.xlu0 %591  ;;  %v758_v18 = vpop.permute.xlu1 %757 }
  0x85   : > { %1210 = vmatpush3.msk.msra.mxu0 %vm268_vm1, %v592_v17 }
  0x86   : > { %1212 = vmatmul.mubr.msk.f32.vlgmr.msra.gmra.mrb[4].mxu0 %vm264_vm2, %v1153_v16  ;;  %1219 = vmatprep.subr.mxu0 %v1290_v0 }
  0x87   : > { %1220 = vmatpush3.msk.msra.mxu0 %vm268_vm1, %v758_v18  ;;  %1221 = vmatprep.mubr.msk.f32.mxu0 %vm1291_vm0, %v1290_v0 }
  0x88   : > { %v670_v20 = vpop.permute.xlu0 %669  ;;  %v836_v21 = vpop.permute.xlu1 %835  ;;  %1229 = vmatprep.subr.mxu0 %v1290_v0 }
  0x89   : > { %1215 = vmatpush3.msk.msra.mxu1 %vm268_vm1, %v670_v20 }
  0x8a   : > { %1217 = vmatmul.mubr.msk.f32.vlgmr.msra.gmra.mrb[4].mxu1 %vm264_vm2, %v1151_v19  ;;  %1224 = vmatprep.subr.mxu1 %v1290_v0 }
  0x8b   : > { %1225 = vmatpush3.msk.msra.mxu1 %vm268_vm1, %v836_v21  ;;  %1226 = vmatprep.mubr.msk.f32.mxu1 %vm1291_vm0, %v1290_v0 }
  0x8c   : > { %1222 = vmatmul.mubr.msk.f32.vlgmr.msra.gmra.mrb[6].mxu0 %vm264_vm2, %v1160_v22  ;;  %v921_v24 = vpop.permute.xlu0 %920 }
  0x8d   : > { %1230 = vmatpush3.msk.msra.mxu0 %vm268_vm1, %v921_v24  ;;  %1231 = vmatprep.mubr.msk.f32.mxu0 %vm1291_vm0, %v1290_v0 }
  0x8e   : > { %1227 = vmatmul.mubr.msk.f32.vlgmr.msra.gmra.mrb[6].mxu1 %vm264_vm2, %v1158_v23 }
  0x90   : > { %1232 = vmatmul.mubr.msk.f32.vlgmr.msra.gmra.mrb[8].mxu0 %vm264_vm2, %v1165_v25 }
  0x9c   : > { %v1009_v57 = vpop.permute.xlu1 %1008 }
  0xe7   : > { %v338_v26 = vpop.f32.mrb[0].mxu0 }
  0xe8   : > { %v1193_v27 = vpop.f32.mrb[1].mxu0  ;;  %v414_v28 = vpop.f32.mrb[0].mxu1 }
  0xe9   : > { %v415_v29 = vadd.f32 %v414_v28, %v338_v26  ;;  %v1198_v30 = vpop.f32.mrb[1].mxu1 }
  0xeb   : > { %v494_v31 = vpop.f32.mrb[2].mxu0 }
  0xec   : > { %v498_v32 = vadd.f32 %v494_v31, %v415_v29  ;;  %v1203_v33 = vpop.f32.mrb[3].mxu0 }
  0xed   : > { %v575_v34 = vpop.f32.mrb[2].mxu1 }
  0xee   : > { %v579_v36 = vadd.f32 %v575_v34, %v498_v32  ;;  %v1208_v37 = vpop.f32.mrb[3].mxu1 }
  0xf0   : > { %v581_v38 = vadd.f32 %v580_v35, %v579_v36 }
  0xf2   : > { %583 = vst.msk [vmem:[#allocation2] sm:$0xff] %vm256_vm3, %v581_v38 }
  0xf9   : > { %v746_v44 = vld [vmem:[#allocation2] sm:$0xff] }
 0x159   : > { %v664_v39 = vpop.f32.mrb[4].mxu0 }
 0x15a   : > { %v1213_v40 = vpop.f32.mrb[5].mxu0 }
 0x15d   : > { %v742_v41 = vpop.f32.mrb[4].mxu1 }
 0x15e   : > { %v743_v42 = vadd.f32 %v742_v41, %v664_v39  ;;  %v1218_v43 = vpop.f32.mrb[5].mxu1 }
 0x15f   : > { %v830_v45 = vpop.f32.mrb[6].mxu0 }
 0x160   : > { %v747_v46 = vadd.f32 %v746_v44, %v743_v42  ;;  %v1223_v47 = vpop.f32.mrb[7].mxu0 }
 0x161   : > { %v908_v48 = vpop.f32.mrb[6].mxu1 }
 0x162   : > { %749 = vst.msk [vmem:[#allocation2] sm:$0xff] %vm748_vm4, %v747_v46  ;;  %v909_v49 = vadd.f32 %v908_v48, %v830_v45  ;;  %v1228_v50 = vpop.f32.mrb[7].mxu1 }
 0x163   : > { %v993_v51 = vpop.f32.mrb[8].mxu0 }
 0x164   : > { %v1233_v52 = vpop.f32.mrb[9].mxu0 }
 0x169   : > { %v912_v53 = vld [vmem:[#allocation2] sm:$0xff] }
 0x16a   : > { %v913_v54 = vadd.f32 %v912_v53, %v909_v49 }
 0x16c   : > { %915 = vst.msk [vmem:[#allocation2] sm:$0xff] %vm914_vm5, %v913_v54 }
 0x173   : > { %v997_v55 = vld [vmem:[#allocation2] sm:$0xff] }
 0x174   : > { %v998_v56 = vadd.f32 %v997_v55, %v993_v51 }
 0x176   : > { %1000 = vst.msk [vmem:[#allocation2] sm:$0xff] %vm999_vm6, %v998_v56 }
 0x17d   : > { %v1004_v58 = vld [vmem:[#allocation2] sm:$0xff] }
 0x17e   : > { %v1011_v59 = vadd.f32 %v1009_v57, %v1004_v58 }
 0x180   : > { %1012 = vst.msk [vmem:[%s251_s23] sm:$0xff] %vm256_vm3, %v1011_v59 }
 0x181 PF: > { %s13_s14 = sadd.s32 1, %s1288_s14   ;;  %s1436_s12 = smov %s1284_s13 }
 0x182   : > { %p10_p5 = scmp.ge.s32.totalorder %s13_s14, 4   ;;  %s1437_s13 = smov %s1439_s15 }
 0x184   :  { %12 = sbr.rel (!%p10_p5) target bundleno = 2 (0x2), region = 87 }

</bundles_post_ra>
